<compile_context>
chip_gen: v5e
topology: v5e:2x2
jax: 0.10.0
libtpu: 0.0.40
codegen_flags: <defaults>
</compile_context>

<pallas_src>
import functools

import jax
import jax.numpy as jnp
from jax import lax
from jax.experimental import pallas as pl
from jax.experimental.pallas import tpu as pltpu


def _meta_loss_kernel(pred_ref, y_ref, w1_ref, w2_ref, w3_ref, w4_ref, out_ref,
                      *, tile_p, p_total):
    pid = pl.program_id(0)

    p = pred_ref[...]                       # (1, tile_p) f32, pixels on lanes
    t = y_ref[...]                          # (1, tile_p) f32
    w1 = w1_ref[...]                        # (16, 2)

    # Layer 1 (1x1 conv over the 2-channel [pred, y] concat) as VPU broadcasts:
    #   h1[o, pix] = relu(w1[o,0]*pred[pix] + w1[o,1]*y[pix])
    h = jnp.maximum(w1[:, 0:1] * p + w1[:, 1:2] * t, 0.0)          # (16, tile_p)

    # Layers 2-4 on the MXU: W(co, ci) @ h(ci, tile_p) -> (co, tile_p).
    h = jnp.maximum(
        jnp.dot(w2_ref[...], h, preferred_element_type=jnp.float32), 0.0)   # (8, tile_p)
    h = jnp.maximum(
        jnp.dot(w3_ref[...], h, preferred_element_type=jnp.float32), 0.0)   # (4, tile_p)
    z = jnp.dot(w4_ref[...], h, preferred_element_type=jnp.float32)         # (1, tile_p)

    # Numerically stable softplus: log(1 + exp(z)).
    sp = jnp.maximum(z, 0.0) + jnp.log1p(jnp.exp(-jnp.abs(z)))

    # Mask the ragged tail of the last tile (padded lanes would otherwise
    # contribute garbage); per-lane independence means valid lanes are clean.
    idx = pid * tile_p + lax.broadcasted_iota(jnp.int32, sp.shape, 1)
    sp = jnp.where(idx < p_total, sp, 0.0)

    # Per-tile partial sum written to this tile's own lane-dense output block.
    tile_sum = jnp.sum(sp)                                          # scalar
    lane = lax.broadcasted_iota(jnp.int32, (1, 128), 1)
    out_ref[...] = jnp.where(lane == 0, tile_sum, 0.0)


def _round_up(x, m):
    return (x + m - 1) // m * m


def meta_loss_2d(pred, y, weights, *, tile_p=32768):
    """pred, y: (N, 1, H, W) float32 (NCHW, like PyTorch). Returns scalar mean loss."""
    w1, w2, w3, w4 = weights                # conv weights, shape (out, in, 1, 1)

    assert pred.shape[1] == 1 and y.shape[1] == 1, "MetaLoss2D expects 1-channel pred and y"
    assert tile_p % 128 == 0

    n, _, hh, ww = pred.shape
    p_total = n * hh * ww

    # (N, 1, H, W) -> (1, P): pure reshape (C == 1), no extra HBM pass.
    pred_flat = pred.reshape(1, p_total).astype(jnp.float32)
    y_flat = y.reshape(1, p_total).astype(jnp.float32)

    # Clamp tile so tiny inputs still produce a valid lane-aligned block.
    tile_p = min(tile_p, _round_up(p_total, 128))
    num_tiles = (p_total + tile_p - 1) // tile_p

    # Conv weights (out, in, 1, 1) -> (out, in); W @ h(ci, P) == 1x1 conv.
    wm = [wi[:, :, 0, 0].astype(jnp.float32) for wi in (w1, w2, w3, w4)]

    kernel = functools.partial(_meta_loss_kernel, tile_p=tile_p, p_total=p_total)

    def full(shape):
        return pl.BlockSpec(shape, lambda i: (0, 0))

    partials = pl.pallas_call(
        kernel,
        out_shape=jax.ShapeDtypeStruct((1, num_tiles * 128), jnp.float32),
        grid_spec=pltpu.PrefetchScalarGridSpec(
            num_scalar_prefetch=0,
            grid=(num_tiles,),
            in_specs=[
                pl.BlockSpec((1, tile_p), lambda i: (0, i)),   # pred pixels
                pl.BlockSpec((1, tile_p), lambda i: (0, i)),   # y pixels
                full(wm[0].shape),                             # (16, 2)
                full(wm[1].shape),                             # (8, 16)
                full(wm[2].shape),                             # (4, 8)
                full(wm[3].shape),                             # (1, 4)
            ],
            out_specs=pl.BlockSpec((1, 128), lambda i: (0, i)),
        ),
        compiler_params=pltpu.CompilerParams(
            dimension_semantics=("parallel",),     # per-tile outputs -> megacore OK
            vmem_limit_bytes=32 * 1024 * 1024,     # safe on v5e/v6e/v7x
        ),
    )(pred_flat, y_flat, *wm)

    # Tiny final reduction over per-tile partials (tree-summed by XLA).
    return jnp.sum(partials) / jnp.float32(p_total)


def xavier_uniform_conv(key, out_c, in_c, gain=1.0):
    # Conv2d kernel size 1: fan_in = in_c, fan_out = out_c
    bound = gain * jnp.sqrt(6.0 / (in_c + out_c))
    return jax.random.uniform(key, (out_c, in_c, 1, 1),
                              minval=-bound, maxval=bound, dtype=jnp.float32)


def reference_meta_loss(pred, y, weights):
    """Pure-JAX reference of the PyTorch forward."""
    x = jnp.concatenate([pred, y], axis=1)                      # (N, 2, H, W)
    h = x
    for i, w in enumerate(weights):
        h = jnp.einsum('nchw,oc->nohw', h, w[:, :, 0, 0])       # 1x1 conv, no bias
        if i < len(weights) - 1:
            h = jnp.maximum(h, 0.0)
    sp = jnp.maximum(h, 0.0) + jnp.log1p(jnp.exp(-jnp.abs(h)))  # softplus
    return jnp.mean(sp)


if __name__ == "__main__":
    key = jax.random.PRNGKey(0)
    k_pred, k_y, k1, k2, k3, k4 = jax.random.split(key, 6)

    # Small shapes: batch=2, 1 channel each for pred/y, spatial 16x16
    pred = jax.random.normal(k_pred, (2, 1, 16, 16), dtype=jnp.float32)
    y = jax.random.normal(k_y, (2, 1, 16, 16), dtype=jnp.float32)

    weights = (
        xavier_uniform_conv(k1, 16, 2),
        xavier_uniform_conv(k2, 8, 16),
        xavier_uniform_conv(k3, 4, 8),
        xavier_uniform_conv(k4, 1, 4),
    )

    out = meta_loss_2d(pred, y, weights)
    out = jax.block_until_ready(out)

    ref = jax.block_until_ready(reference_meta_loss(pred, y, weights))
    assert jnp.allclose(out, ref, atol=1e-5, rtol=1e-5), (out, ref)

    print("KERNEL_OK")
</pallas_src>

<mosaic_0001>
module attributes {stable_mosaic.version = 11 : i64} {
  func.func @_meta_loss_kernel(%arg0: i32, %arg1: memref<1x512xf32, #tpu.memory_space<vmem>>, %arg2: memref<1x512xf32, #tpu.memory_space<vmem>>, %arg3: memref<16x2xf32, #tpu.memory_space<vmem>>, %arg4: memref<8x16xf32, #tpu.memory_space<vmem>>, %arg5: memref<4x8xf32, #tpu.memory_space<vmem>>, %arg6: memref<1x4xf32, #tpu.memory_space<vmem>>, %arg7: memref<1x128xf32, #tpu.memory_space<vmem>>) attributes {dimension_semantics = [#tpu.dimension_semantics<parallel>], iteration_bounds = array<i64: 1>, scalar_prefetch = 0 : i64, scratch_operands = 0 : i64, tpu.core_type = #tpu.core_type<tc>, window_params = [{transform_indices = @transform_0, window_bounds = array<i64: 1, 512>}, {transform_indices = @transform_1, window_bounds = array<i64: 1, 512>}, {pipeline_mode = #tpu.pipeline_mode<synchronous>, transform_indices = @transform_2, window_bounds = array<i64: 16, 2>}, {pipeline_mode = #tpu.pipeline_mode<synchronous>, transform_indices = @transform_3, window_bounds = array<i64: 8, 16>}, {pipeline_mode = #tpu.pipeline_mode<synchronous>, transform_indices = @transform_4, window_bounds = array<i64: 4, 8>}, {pipeline_mode = #tpu.pipeline_mode<synchronous>, transform_indices = @transform_5, window_bounds = array<i64: 1, 4>}, {transform_indices = @transform_6, window_bounds = array<i64: 1, 128>}]} {
    %c0 = arith.constant 0 : index
    %c0_0 = arith.constant 0 : index
    %0 = vector.load %arg1[%c0, %c0_0] : memref<1x512xf32, #tpu.memory_space<vmem>>, vector<1x512xf32>
    %c0_1 = arith.constant 0 : index
    %c0_2 = arith.constant 0 : index
    %1 = vector.load %arg2[%c0_1, %c0_2] : memref<1x512xf32, #tpu.memory_space<vmem>>, vector<1x512xf32>
    %c0_3 = arith.constant 0 : index
    %c0_4 = arith.constant 0 : index
    %2 = vector.load %arg3[%c0_3, %c0_4] : memref<16x2xf32, #tpu.memory_space<vmem>>, vector<16x2xf32>
    %3 = vector.extract_strided_slice %2 {offsets = [0, 0], sizes = [16, 1], strides = [1, 1]} : vector<16x2xf32> to vector<16x1xf32>
    %4 = vector.broadcast %3 : vector<16x1xf32> to vector<16x512xf32>
    %5 = vector.broadcast %0 : vector<1x512xf32> to vector<16x512xf32>
    %6 = arith.mulf %4, %5 : vector<16x512xf32>
    %7 = vector.extract_strided_slice %2 {offsets = [0, 1], sizes = [16, 1], strides = [1, 1]} : vector<16x2xf32> to vector<16x1xf32>
    %8 = vector.broadcast %7 : vector<16x1xf32> to vector<16x512xf32>
    %9 = vector.broadcast %1 : vector<1x512xf32> to vector<16x512xf32>
    %10 = arith.mulf %8, %9 : vector<16x512xf32>
    %11 = arith.addf %6, %10 : vector<16x512xf32>
    %cst = arith.constant 0.000000e+00 : f32
    %12 = vector.broadcast %cst : f32 to vector<16x512xf32>
    %13 = arith.maximumf %11, %12 : vector<16x512xf32>
    %c0_5 = arith.constant 0 : index
    %c0_6 = arith.constant 0 : index
    %14 = vector.load %arg4[%c0_5, %c0_6] : memref<8x16xf32, #tpu.memory_space<vmem>>, vector<8x16xf32>
    %cst_7 = arith.constant dense<0.000000e+00> : vector<8x512xf32>
    %15 = tpu.matmul %14, %13, %cst_7 {dimension_numbers = #tpu.dot_dimension_numbers<[1], [0], [0], [1], [0, 0, 1, 1], [], []>} : vector<8x16xf32>, vector<16x512xf32>, vector<8x512xf32> -> vector<8x512xf32>
    %cst_8 = arith.constant 0.000000e+00 : f32
    %16 = vector.broadcast %cst_8 : f32 to vector<8x512xf32>
    %17 = arith.maximumf %15, %16 : vector<8x512xf32>
    %c0_9 = arith.constant 0 : index
    %c0_10 = arith.constant 0 : index
    %18 = vector.load %arg5[%c0_9, %c0_10] : memref<4x8xf32, #tpu.memory_space<vmem>>, vector<4x8xf32>
    %cst_11 = arith.constant dense<0.000000e+00> : vector<4x512xf32>
    %19 = tpu.matmul %18, %17, %cst_11 {dimension_numbers = #tpu.dot_dimension_numbers<[1], [0], [0], [1], [0, 0, 1, 1], [], []>} : vector<4x8xf32>, vector<8x512xf32>, vector<4x512xf32> -> vector<4x512xf32>
    %cst_12 = arith.constant 0.000000e+00 : f32
    %20 = vector.broadcast %cst_12 : f32 to vector<4x512xf32>
    %21 = arith.maximumf %19, %20 : vector<4x512xf32>
    %c0_13 = arith.constant 0 : index
    %c0_14 = arith.constant 0 : index
    %22 = vector.load %arg6[%c0_13, %c0_14] : memref<1x4xf32, #tpu.memory_space<vmem>>, vector<1x4xf32>
    %cst_15 = arith.constant dense<0.000000e+00> : vector<1x512xf32>
    %23 = tpu.matmul %22, %21, %cst_15 {dimension_numbers = #tpu.dot_dimension_numbers<[1], [0], [0], [1], [0, 0, 1, 1], [], []>} : vector<1x4xf32>, vector<4x512xf32>, vector<1x512xf32> -> vector<1x512xf32>
    %cst_16 = arith.constant 0.000000e+00 : f32
    %24 = vector.broadcast %cst_16 : f32 to vector<1x512xf32>
    %25 = arith.maximumf %23, %24 : vector<1x512xf32>
    %26 = math.absf %23 : vector<1x512xf32>
    %cst_17 = arith.constant 0.000000e+00 : f32
    %27 = vector.broadcast %cst_17 : f32 to vector<1x512xf32>
    %28 = arith.subf %27, %26 : vector<1x512xf32>
    %29 = math.exp %28 : vector<1x512xf32>
    %30 = math.log1p %29 : vector<1x512xf32>
    %31 = arith.addf %25, %30 : vector<1x512xf32>
    %c512_i32 = arith.constant 512 : i32
    %32 = arith.muli %arg0, %c512_i32 : i32
    %33 = tpu.iota {dimensions = array<i32: 1>} : vector<1x512xi32>
    %34 = vector.broadcast %32 : i32 to vector<1x512xi32>
    %35 = arith.addi %34, %33 : vector<1x512xi32>
    %c512_i32_18 = arith.constant 512 : i32
    %36 = vector.broadcast %c512_i32_18 : i32 to vector<1x512xi32>
    %37 = arith.cmpi slt, %35, %36 : vector<1x512xi32>
    %cst_19 = arith.constant 0.000000e+00 : f32
    %38 = vector.broadcast %cst_19 : f32 to vector<1x512xf32>
    %39 = arith.select %37, %31, %38 : vector<1x512xi1>, vector<1x512xf32>
    %40 = vector.shape_cast %39 : vector<1x512xf32> to vector<1x1x512xf32>
    %cst_20 = arith.constant dense<0.000000e+00> : vector<1xf32>
    %41 = vector.multi_reduction <add>, %40, %cst_20 [1, 2] : vector<1x1x512xf32> to vector<1xf32>
    %42 = vector.shape_cast %41 : vector<1xf32> to vector<1x1x1xf32>
    %43 = vector.extract %42[0, 0, 0] : f32 from vector<1x1x1xf32>
    %44 = tpu.iota {dimensions = array<i32: 1>} : vector<1x128xi32>
    %c0_i32 = arith.constant 0 : i32
    %45 = vector.broadcast %c0_i32 : i32 to vector<1x128xi32>
    %46 = arith.cmpi eq, %44, %45 : vector<1x128xi32>
    %cst_21 = arith.constant 0.000000e+00 : f32
    %47 = vector.broadcast %43 : f32 to vector<1x128xf32>
    %48 = vector.broadcast %cst_21 : f32 to vector<1x128xf32>
    %49 = arith.select %46, %47, %48 : vector<1x128xi1>, vector<1x128xf32>
    %c0_22 = arith.constant 0 : index
    %c0_23 = arith.constant 0 : index
    %50 = vector.load %arg7[%c0_22, %c0_23] : memref<1x128xf32, #tpu.memory_space<vmem>>, vector<1x128xf32>
    tpu.vector_store %arg7[%c0_22, %c0_23], %49 {strides = array<i32>} : memref<1x128xf32, #tpu.memory_space<vmem>>, vector<1x128xf32>,
    return
  }
  func.func @transform_0(%arg0: i32) -> (i32, i32) {
    %c0_i32 = arith.constant 0 : i32
    %c0_i32_0 = arith.constant 0 : i32
    return %c0_i32, %arg0 : i32, i32
  }
  func.func @transform_1(%arg0: i32) -> (i32, i32) {
    %c0_i32 = arith.constant 0 : i32
    %c0_i32_0 = arith.constant 0 : i32
    return %c0_i32, %arg0 : i32, i32
  }
  func.func @transform_2(%arg0: i32) -> (i32, i32) {
    %c0_i32 = arith.constant 0 : i32
    %c0_i32_0 = arith.constant 0 : i32
    %c0_i32_1 = arith.constant 0 : i32
    return %c0_i32, %c0_i32_0 : i32, i32
  }
  func.func @transform_3(%arg0: i32) -> (i32, i32) {
    %c0_i32 = arith.constant 0 : i32
    %c0_i32_0 = arith.constant 0 : i32
    %c0_i32_1 = arith.constant 0 : i32
    return %c0_i32, %c0_i32_0 : i32, i32
  }
  func.func @transform_4(%arg0: i32) -> (i32, i32) {
    %c0_i32 = arith.constant 0 : i32
    %c0_i32_0 = arith.constant 0 : i32
    %c0_i32_1 = arith.constant 0 : i32
    return %c0_i32, %c0_i32_0 : i32, i32
  }
  func.func @transform_5(%arg0: i32) -> (i32, i32) {
    %c0_i32 = arith.constant 0 : i32
    %c0_i32_0 = arith.constant 0 : i32
    %c0_i32_1 = arith.constant 0 : i32
    return %c0_i32, %c0_i32_0 : i32, i32
  }
  func.func @transform_6(%arg0: i32) -> (i32, i32) {
    %c0_i32 = arith.constant 0 : i32
    %c0_i32_0 = arith.constant 0 : i32
    return %c0_i32, %arg0 : i32, i32
  }
}

</mosaic_0001>

<bundles_post_ra>
// kernel: tpu_custom_call.1
= control target key start
LH: loop header
LB: loop body
LE: loop exit
PB: predicated region body
PF: predicated region fallthrough
CT: control target
= control target key end

     0   :  { %s621_s0 = inlined_call_operand.vmem [shape: f32[1,512], index: 0, kind: input, shape index: {}]   ;;  %s622_s1 = inlined_call_operand.vmem [shape: f32[1,512], index: 1, kind: input, shape index: {}]   ;;  %s623_s2 = inlined_call_operand.vmem [shape: f32[16,2], index: 2, kind: input, shape index: {}]   ;;  %s624_s3 = inlined_call_operand.vmem [shape: f32[8,16], index: 3, kind: input, shape index: {}]   ;;  %s625_s4 = inlined_call_operand.vmem [shape: f32[4,8], index: 4, kind: input, shape index: {}]   ;;  %s626_s5 = inlined_call_operand.vmem [shape: f32[1,4], index: 5, kind: input, shape index: {}]   ;;  %s627_s6 = inlined_call_operand.hbm [shape: f32[1,128], index: 6, kind: output, shape index: {}]  }
   0x1   :  { %v27_v0 = vld [vmem:[%s623_s2 + $0x8] sm:$0xff]  ;;  %v26_v1 = vld [vmem:[%s623_s2] sm:$0xff] }
   0x2   :  { %11 = vsyncpa [#allocation3], 0  ;;  %v555_v2 = vmov 0   ;;  %v556_v3 = vmov 1   ;;  %v24_v6 = vld [vmem:[%s621_s0] sm:$0xf] }
   0x3   :  { %511 = vset.pattern.permute.xlu1 %v555_v2  ;;  %509 = vset.pattern.permute.xlu0 %v555_v2  ;;  %v25_v7 = vld [vmem:[%s622_s1] sm:$0xf]  ;;  %v39_v8 = vperm.slane %v24_v6, 0  ;;  %v40_v9 = vperm.slane %v24_v6, 1  ;;  %v41_v10 = vperm.slane %v24_v6, 2  ;;  %v42_v11 = vperm.slane %v24_v6, 3 }
   0x4   :  { %35 = vperm.xlu0 %509, %v27_v0   ;;  %30 = vperm.xlu1 %511, %v26_v1   ;;  %v64_v12 = vperm.slane %v25_v7, 0  ;;  %v65_v13 = vperm.slane %v25_v7, 1  ;;  %v66_v14 = vperm.slane %v25_v7, 2  ;;  %v67_v15 = vperm.slane %v25_v7, 3  ;;  %v96_v50 = vld [vmem:[%s624_s3] sm:$0xff]  ;;  %s479_s9 = sshll.u32 %s627_s6, 4  ;;  %s480_s9 = int_to_ptr.hbm [resolvable:$true] %s479_s9 }
   0x5   :  { %vm97_vm0 = vcmask 130048   ;;  %v185_v55 = vld [vmem:[%s625_s4] sm:$0xf]  ;;  %vm186_vm1 = vcmask 64512   ;;  %vm279_vm2 = vcmask 1043456   ;;  %vm275_vm3 = vcmask 31744  }
   0x6   :  { %vm451_vm6 = vcmask 1040384  }
   0xc   :  { %510 = vset.pattern.permute.xlu0 %v556_v3  ;;  %512 = vset.pattern.permute.xlu1 %v556_v3 }
   0xd   :  { %60 = vperm.xlu0 %510, %v27_v0   ;;  %56 = vperm.xlu1 %512, %v26_v1   ;;  %v274_v0 = vld [vmem:[%s626_s5] sm:$0x1]  ;;  %s557_s5 = smov [#allocation2]  }
   0xe   :  { %s477_s30 = sshll.u32 %s557_s5, 4  ;;  %s478_s30 = int_to_ptr.vmem [resolvable:$true] %s477_s30 }
  0x76   :  { %v36_v4 = vpop.permute.xlu0 %35  ;;  %v31_v5 = vpop.permute.xlu1 %30 }
  0x77   :  { %v51_v16 = vmul.f32 %v39_v8, %v36_v4  ;;  %v52_v17 = vmul.f32 %v40_v9, %v36_v4  ;;  %v53_v20 = vmul.f32 %v41_v10, %v36_v4  ;;  %v54_v21 = vmul.f32 %v42_v11, %v36_v4 }
  0x78   :  { %v47_v22 = vmul.f32 %v39_v8, %v31_v5  ;;  %v48_v23 = vmul.f32 %v40_v9, %v31_v5  ;;  %v49_v34 = vmul.f32 %v41_v10, %v31_v5  ;;  %v50_v35 = vmul.f32 %v42_v11, %v31_v5 }
  0x7f   :  { %v61_v18 = vpop.permute.xlu0 %60  ;;  %v57_v19 = vpop.permute.xlu1 %56 }
  0x80   :  { %v72_v24 = vmul.f32 %v64_v12, %v57_v19  ;;  %v73_v25 = vmul.f32 %v65_v13, %v57_v19  ;;  %v74_v26 = vmul.f32 %v66_v14, %v57_v19  ;;  %v75_v27 = vmul.f32 %v67_v15, %v57_v19 }
  0x81   :  { %v76_v28 = vmul.f32 %v64_v12, %v61_v18  ;;  %v77_v29 = vmul.f32 %v65_v13, %v61_v18  ;;  %v78_v30 = vmul.f32 %v66_v14, %v61_v18  ;;  %v79_v31 = vmul.f32 %v67_v15, %v61_v18 }
  0x82   :  { %v80_v32 = vadd.f32 %v72_v24, %v47_v22  ;;  %v81_v33 = vadd.f32 %v73_v25, %v48_v23  ;;  %v82_v40 = vadd.f32 %v74_v26, %v49_v34  ;;  %v83_v41 = vadd.f32 %v75_v27, %v50_v35 }
  0x83   :  { %v84_v36 = vadd.f32 %v76_v28, %v51_v16  ;;  %v85_v37 = vadd.f32 %v77_v29, %v52_v17  ;;  %v86_v38 = vadd.f32 %v78_v30, %v53_v20  ;;  %v87_v39 = vadd.f32 %v79_v31, %v54_v21 }
  0x84   :  { %v88_v46 = vmax.f32 %v80_v32, 0.0  ;;  %v89_v47 = vmax.f32 %v81_v33, 0.0  ;;  %v90_v48 = vmax.f32 %v82_v40, 0.0  ;;  %v91_v49 = vmax.f32 %v83_v41, 0.0 }
  0x85   :  { %v92_v42 = vmax.f32 %v84_v36, 0.0  ;;  %v93_v43 = vmax.f32 %v85_v37, 0.0  ;;  %v94_v44 = vmax.f32 %v86_v38, 0.0  ;;  %v95_v45 = vmax.f32 %v87_v39, 0.0 }
  0x87   :  { %115 = vmatpush.msra.mxu0 %v92_v42  ;;  %135 = vmatpush.msra.mxu1 %v93_v43 }
  0x88   :  { %155 = vmatpush.msra.mxu2 %v94_v44  ;;  %175 = vmatpush.msra.mxu3 %v95_v45 }
  0x89   :  { %116 = vmatpush.msra.mxu0 %v88_v46  ;;  %136 = vmatpush.msra.mxu1 %v89_v47 }
  0x8a   :  { %156 = vmatpush.msra.mxu2 %v90_v48  ;;  %176 = vmatpush.msra.mxu3 %v91_v49 }
  0x8b   :  { %488 = vmatmul.msk.f32.vlgmr.msra.gmra.mxu0 %vm97_vm0, %v96_v50  ;;  %489 = vmatmul.msk.f32.vlgmr.msra.gmra.mxu1 %vm97_vm0, %v96_v50 }
  0x8c   :  { %490 = vmatmul.msk.f32.vlgmr.msra.gmra.mxu2 %vm97_vm0, %v96_v50  ;;  %491 = vmatmul.msk.f32.vlgmr.msra.gmra.mxu3 %vm97_vm0, %v96_v50 }
 0x108   :  { %v118_v51 = vpop.f32.mrf.mxu0  ;;  %v138_v52 = vpop.f32.mrf.mxu1 }
 0x109   :  { %v181_v53 = vmax.f32 %v118_v51, 0.0  ;;  %v182_v54 = vmax.f32 %v138_v52, 0.0 }
 0x10b   :  { %205 = vmatpush.msrb.mxu0 %v181_v53  ;;  %225 = vmatpush.msrb.mxu1 %v182_v54 }
 0x10c   :  { %492 = vmatmul.msk.f32.vlgmr.msrb.gmra.mxu0 %vm186_vm1, %v185_v55  ;;  %493 = vmatmul.msk.f32.vlgmr.msrb.gmra.mxu1 %vm186_vm1, %v185_v55 }
 0x10f   :  { %v158_v56 = vpop.f32.mrf.mxu2  ;;  %v178_v57 = vpop.f32.mrf.mxu3 }
 0x110   :  { %v183_v58 = vmax.f32 %v158_v56, 0.0  ;;  %v184_v59 = vmax.f32 %v178_v57, 0.0 }
 0x112   :  { %245 = vmatpush.msrb.mxu2 %v183_v58  ;;  %265 = vmatpush.msrb.mxu3 %v184_v59 }
 0x113   :  { %494 = vmatmul.msk.f32.vlgmr.msrb.gmra.mxu2 %vm186_vm1, %v185_v55  ;;  %495 = vmatmul.msk.f32.vlgmr.msrb.gmra.mxu3 %vm186_vm1, %v185_v55 }
 0x189   :  { %v207_v60 = vpop.f32.mrf.mxu0  ;;  %v227_v61 = vpop.f32.mrf.mxu1 }
 0x18a   :  { %v270_v62 = vmax.f32 %v207_v60, 0.0  ;;  %v271_v63 = vmax.f32 %v227_v61, 0.0 }
 0x18c   :  { %496 = vmatpush.msk.msra.mxu0 %vm279_vm2, %v270_v62  ;;  %498 = vmatpush.msk.msra.mxu1 %vm279_vm2, %v271_v63 }
 0x18d   :  { %497 = vmatmul.msk.f32.vlgmr.msra.gmra.mxu0 %vm275_vm3, %v274_v0  ;;  %499 = vmatmul.msk.f32.vlgmr.msra.gmra.mxu1 %vm275_vm3, %v274_v0 }
 0x196   :  { %v247_v1 = vpop.f32.mrf.mxu2  ;;  %v267_v2 = vpop.f32.mrf.mxu3 }
 0x197   :  { %v272_v3 = vmax.f32 %v247_v1, 0.0  ;;  %v273_v4 = vmax.f32 %v267_v2, 0.0 }
 0x199   :  { %500 = vmatpush.msk.msra.mxu2 %vm279_vm2, %v272_v3  ;;  %502 = vmatpush.msk.msra.mxu3 %vm279_vm2, %v273_v4 }
 0x19a   :  { %501 = vmatmul.msk.f32.vlgmr.msra.gmra.mxu2 %vm275_vm3, %v274_v0  ;;  %503 = vmatmul.msk.f32.vlgmr.msra.gmra.mxu3 %vm275_vm3, %v274_v0 }
 0x20a   :  { %v309_v5 = vpop.f32.mrf.mxu0  ;;  %v329_v6 = vpop.f32.mrf.mxu1 }
 0x20b   :  { %v376_v7 = vand.u32 2147483647, %v309_v5  ;;  %v377_v8 = vand.u32 2147483647, %v329_v6  ;;  %v372_v44 = vmax.f32 %v309_v5, 0.0  ;;  %v373_v46 = vmax.f32 %v329_v6, 0.0 }
 0x20d   :  { %v380_v9 = vsub.f32 0.0, %v376_v7  ;;  %v381_v10 = vsub.f32 0.0, %v377_v8 }
 0x20f   :  { %v384_v11 = vmul.f32 1.442695, %v380_v9  ;;  %v386_v12 = vmul.f32 1.442695, %v381_v10 }
 0x211   :  { %513 = vpow2.f32 %v384_v11 }
 0x212   :  { %515 = vpow2.f32 %v386_v12 }
 0x217   :  { %v514_v13 = vpop.eup %513 }
 0x218   :  { %v516_v14 = vpop.eup %515  ;;  %v392_v15 = vadd.f32 1.0, %v514_v13  ;;  %v395_v23 = vmul.f32 -0.5, %v514_v13  ;;  %v398_v29 = vand.u32 2147483647, %v514_v13 }
 0x219   :  { %v401_v16 = vadd.f32 1.0, %v516_v14  ;;  %v404_v24 = vmul.f32 -0.5, %v516_v14  ;;  %v407_v32 = vand.u32 2147483647, %v516_v14 }
 0x21a   :  { %517 = vlog2.f32 %v392_v15  ;;  %v396_v27 = vadd.f32 1.0, %v395_v23  ;;  %vm399_vm4 = vcmp.lt.f32.partialorder %v398_v29, 0.0004427343  ;;  %v433_v15 = vlaneseq }
 0x21b   :  { %519 = vlog2.f32 %v401_v16  ;;  %v405_v30 = vadd.f32 1.0, %v404_v24  ;;  %vm408_vm5 = vcmp.lt.f32.partialorder %v407_v32, 0.0004427343 }
 0x21c   :  { %v397_v34 = vmul.f32 %v514_v13, %v396_v27  ;;  %v434_v16 = vand.u32 127, %v433_v15 }
 0x21d   :  { %v349_v17 = vpop.f32.mrf.mxu2  ;;  %v369_v18 = vpop.f32.mrf.mxu3  ;;  %v406_v37 = vmul.f32 %v516_v14, %v405_v30 }
 0x21e   :  { %v378_v19 = vand.u32 2147483647, %v349_v17  ;;  %v379_v20 = vand.u32 2147483647, %v369_v18  ;;  %v374_v56 = vmax.f32 %v349_v17, 0.0  ;;  %v375_v63 = vmax.f32 %v369_v18, 0.0 }
 0x21f   :  { %vm468_vm9 = vcmp.eq.s32.totalorder %v434_v16, 0 }
 0x220   :  { %v382_v21 = vsub.f32 0.0, %v378_v19  ;;  %v383_v22 = vsub.f32 0.0, %v379_v20  ;;  %v518_v28 = vpop.eup %517 }
 0x221   :  { %v520_v31 = vpop.eup %519  ;;  %v394_v33 = vmul.f32 0.6931472, %v518_v28 }
 0x222   :  { %v388_v25 = vmul.f32 1.442695, %v382_v21  ;;  %v390_v26 = vmul.f32 1.442695, %v383_v22  ;;  %v403_v36 = vmul.f32 0.6931472, %v520_v31 }
 0x223   :  { %v400_v42 = vsel %vm399_vm4, %v397_v34, %v394_v33 }
 0x224   :  { %521 = vpow2.f32 %v388_v25  ;;  %v409_v45 = vsel %vm408_vm5, %v406_v37, %v403_v36  ;;  %v428_v47 = vadd.f32 %v400_v42, %v372_v44 }
 0x225   :  { %523 = vpow2.f32 %v390_v26  ;;  %v429_v49 = vadd.f32 %v409_v45, %v373_v46 }
 0x226   :  { %v452_v55 = vsel %vm451_vm6, %v428_v47, 0.0 }
 0x227   :  { %v453_v59 = vsel %vm451_vm6, %v429_v49, 0.0 }
 0x228   :  { %v454_v3 = vadd.f32 %v453_v59, %v452_v55 }
 0x22a   :  { %v522_v35 = vpop.eup %521 }
 0x22b   :  { %v524_v38 = vpop.eup %523  ;;  %v410_v39 = vadd.f32 1.0, %v522_v35  ;;  %v413_v40 = vmul.f32 -0.5, %v522_v35  ;;  %v416_v50 = vand.u32 2147483647, %v522_v35 }
 0x22c   :  { %v419_v41 = vadd.f32 1.0, %v524_v38  ;;  %v422_v43 = vmul.f32 -0.5, %v524_v38  ;;  %v425_v52 = vand.u32 2147483647, %v524_v38 }
 0x22d   :  { %525 = vlog2.f32 %v410_v39  ;;  %v414_v48 = vadd.f32 1.0, %v413_v40  ;;  %vm417_vm7 = vcmp.lt.f32.partialorder %v416_v50, 0.0004427343 }
 0x22e   :  { %527 = vlog2.f32 %v419_v41  ;;  %v423_v51 = vadd.f32 1.0, %v422_v43  ;;  %vm426_vm8 = vcmp.lt.f32.partialorder %v425_v52, 0.0004427343 }
 0x22f   :  { %v415_v58 = vmul.f32 %v522_v35, %v414_v48 }
 0x230   :  { %v424_v61 = vmul.f32 %v524_v38, %v423_v51 }
 0x233   :  { %v526_v53 = vpop.eup %525 }
 0x234   :  { %v528_v54 = vpop.eup %527  ;;  %v412_v57 = vmul.f32 0.6931472, %v526_v53 }
 0x235   :  { %v421_v60 = vmul.f32 0.6931472, %v528_v54 }
 0x236   :  { %v418_v62 = vsel %vm417_vm7, %v415_v58, %v412_v57 }
 0x237   :  { %v430_v0 = vadd.f32 %v418_v62, %v374_v56  ;;  %v427_v1 = vsel %vm426_vm8, %v424_v61, %v421_v60 }
 0x238   :  { %v431_v2 = vadd.f32 %v427_v1, %v375_v63 }
 0x239   :  { %v455_v4 = vsel %vm451_vm6, %v430_v0, 0.0 }
 0x23a   :  { %v456_v5 = vadd.f32 %v455_v4, %v454_v3  ;;  %v457_v6 = vsel %vm451_vm6, %v431_v2, 0.0 }
 0x23c   :  { %v458_v7 = vadd.f32 %v457_v6, %v456_v5 }
 0x23e   :  { %459 = vadd.xlane.f32.xlu2 %v458_v7 }
 0x2b1   :  { %v460_v8 = vpop.xlane.xlu2 %459 }
 0x2b2   :  { %v461_v9 = vrot.slane %v460_v8, 4 }
 0x2b4   :  { %v462_v10 = vadd.f32 %v461_v9, %v460_v8 }
 0x2b6   :  { %v463_v11 = vrot.slane %v462_v10, 2 }
 0x2b8   :  { %v464_v12 = vadd.f32 %v463_v11, %v462_v10 }
 0x2ba   :  { %v465_v13 = vrot.slane %v464_v12, 1 }
 0x2bc   :  { %v466_v14 = vadd.f32 %v465_v13, %v464_v12 }
 0x2be   :  { %504 = vpush %v466_v14 }
 0x2ef   :  { %s505_s10 = spop %504 }
 0x2f0   :  { %v469_v17 = vstv %s505_s10 }
 0x2f1   :  { %v470_v18 = vsel %vm468_vm9, %v469_v17, 0.0 }
 0x2f2   :  { %471 = vst [vmem:[#allocation2] sm:$0x1] %v470_v18 }
 0x2f3   :  { %482 = dma.vmem_to_hbm [thread:$0]  %s478_s30, 16, %s480_s9, [#allocation3]  }
 0x2f4   :  { %553 = dma.done.wait [#allocation3], 16  }
 0x2f5   :  { %554 = vsyncadd [#allocation3], 4294967280 }
 0x2f6   :  { %487 = vsyncpa [#allocation3], 1 }

</bundles_post_ra>
